<compile_context>
chip_gen: v5e
topology: v5e:2x2
jax: 0.10.0
libtpu: 0.0.40
codegen_flags: <defaults>
</compile_context>

<pallas_src>
import math
import jax
import jax.numpy as jnp
from jax import lax
from jax.experimental import pallas as pl
from jax.experimental.pallas import tpu as pltpu

_INV_SQRT2 = 1.0 / math.sqrt(2.0)


def _resblock_kernel(x_ref, gamma_ref, beta_ref, w_ref, bias_ref, o_ref,
                     xn_ref, h_ref):
    j = pl.program_id(1)
    tn = o_ref.shape[-1]

    # LayerNorm + exact (erf) GELU once per row tile; cached for all column steps.
    # TODO(synk): software-pipeline this block against the previous row tile's
    # last matmul (2x xn/h scratch) to hide the XLU/EUP bubble when W is resident.
    @pl.when(j == 0)
    def _():
        x = x_ref[...].astype(jnp.float32)                       # (tm, C)
        mean = jnp.mean(x, axis=-1, keepdims=True)
        xc = x - mean
        var = jnp.mean(xc * xc, axis=-1, keepdims=True)          # two-pass: robust
        xn = xc * lax.rsqrt(var + 1e-5)
        xn = (xn * gamma_ref[...].astype(jnp.float32)
              + beta_ref[...].astype(jnp.float32))
        xn_ref[...] = xn.astype(xn_ref.dtype)
        # Exact erf GELU -> matches torch.nn.GELU() default.
        h_ref[...] = (0.5 * xn * (1.0 + lax.erf(xn * _INV_SQRT2))).astype(h_ref.dtype)

    # Column tile of the projection: (tm, C) @ (C, tn) -> (tm, tn), f32 accumulate.
    y = jnp.dot(h_ref[...], w_ref[...], preferred_element_type=jnp.float32)
    y = y + bias_ref[...].astype(jnp.float32)

    col0 = pl.multiple_of(j * tn, 128)
    o_ref[...] = (xn_ref[:, pl.ds(col0, tn)].astype(jnp.float32) + y).astype(o_ref.dtype)


def _round_up(n, m):
    return ((n + m - 1) // m) * m


def _vmem_capacity_bytes():
    try:
        cap = getattr(pltpu.get_tpu_info(), "vmem_capacity_bytes", None)
        if cap:
            return int(cap)
    except Exception:
        pass
    return 64 << 20   # conservative default: v7x has the smallest per-core VMEM


def _buffered_spec(shape, index_map, buffers):
    if buffers == 2:                       # Pallas default double-buffering
        return pl.BlockSpec(shape, index_map)
    try:
        return pl.BlockSpec(shape, index_map, pipeline_mode=pl.Buffered(buffers))
    except TypeError:                      # older BlockSpec API: fall back to default
        return pl.BlockSpec(shape, index_map)


def simple_res_block(x, gamma, beta, w, bias, *, block_rows=None, block_cols=None,
                     mxu_bf16=True):
    """SimpleResBlock forward.

    x: (..., C).  gamma/beta/bias: (C,).  w: (C, C) in (in, out) layout,
    i.e. torch_linear.weight.T.  Returns an array of x's shape and dtype.
    """
    orig_shape = x.shape
    C = orig_shape[-1]
    assert C % 128 == 0, "channels must be a multiple of 128 for lane-dense tiles"
    # TODO(synk): support C % 128 != 0 (padded channels + masked LN statistics).
    x2 = x.reshape(-1, C)
    rows = x2.shape[0]

    # MXU input dtype: no TPU generation has a native f32 MXU path, so cast f32
    # weights to bf16 (f32 accumulation is kept) unless exactness is requested.
    w_in = w.astype(jnp.bfloat16) if (mxu_bf16 and w.dtype == jnp.float32) else w
    mxu_dtype = w_in.dtype
    xn_dtype = jnp.float32 if x2.dtype == jnp.float32 else x2.dtype

    xb = x2.dtype.itemsize
    wb = jnp.dtype(mxu_dtype).itemsize
    xnb = jnp.dtype(xn_dtype).itemsize

    capacity = _vmem_capacity_bytes()
    budget = (capacity * 7) // 8
    pack = max(8, 32 // x2.dtype.itemsize)                # sublane packing per dtype
    row_cap = max(pack, _round_up(min(rows, 1024), pack))

    def working_set(tm, tn, w_bufs):
        return (2 * tm * C * xb          # x row tiles (double-buffered)
                + w_bufs * C * tn * wb   # weight block(s)
                + 2 * tm * tn * xb       # output tiles (double-buffered)
                + tm * C * xnb           # xn (LayerNorm output) scratch
                + tm * C * wb            # GELU(xn) scratch (MXU input dtype)
                + (2 << 20))             # params (sublane padded) + headroom

    def pick_tm(cands, tn, w_bufs):
        for tm in cands:
            if tm <= row_cap and tm % pack == 0 and working_set(tm, tn, w_bufs) <= budget:
                return tm
        return None

    # --- choose tn / W buffering: keep W resident whenever it fits ------------
    small_tms = (256, 128, 64, 32, 16, 8)
    if block_cols is not None:
        assert C % block_cols == 0 and block_cols % 128 == 0
        tn = block_cols
        resident = tn == C
        w_bufs = 2
        if resident and pick_tm(small_tms, C, 2) is None and pick_tm(small_tms, C, 1):
            w_bufs = 1
    elif pick_tm(small_tms, C, 2) is not None:
        tn, resident, w_bufs = C, True, 2        # resident W, default buffering
    elif pick_tm(small_tms, C, 1) is not None:
        tn, resident, w_bufs = C, True, 1        # resident W, single-buffered (v7x large C)
    else:
        resident, w_bufs = False, 2              # stream column slices of W
        tn = next((c for c in (512, 256, 128) if C % c == 0), 128)

    # --- choose tm -------------------------------------------------------------
    if block_rows is not None:
        tm = min(max(pack, _round_up(block_rows, pack)), row_cap)
    else:
        # Streaming W needs a large row tile (arithmetic intensity ~ tm FLOP per
        # W byte); with W resident a moderate tile keeps x/out/scratch small.
        cands = ((512, 256, 128, 64, 32, 16, 8) if resident
                 else (1024, 768, 512, 256, 128, 64, 32, 16, 8))
        tm = pick_tm(cands, tn, w_bufs)
        if tm is None:
            tm = pack
    if (not resident) and w_bufs == 2 and working_set(tm, tn, 3) <= budget:
        w_bufs = 3                               # deeper W pipelining (v5e/v6e spare VMEM)

    # --- build the call ---------------------------------------------------------
    grid = (pl.cdiv(rows, tm), C // tn)
    gamma2 = gamma.reshape(1, C)
    beta2 = beta.reshape(1, C)
    bias2 = bias.reshape(1, C)

    if resident:
        w_spec = _buffered_spec((C, C), lambda i, j: (0, 0), w_bufs)
    else:
        w_spec = _buffered_spec((C, tn), lambda i, j: (0, j), w_bufs)

    ws = working_set(tm, tn, w_bufs)
    vmem_limit = int(min(max(ws * 5 // 4, 32 << 20), capacity - (4 << 20)))

    n_row_tiles = pl.cdiv(rows, tm)
    w_reads = 1 if resident else n_row_tiles
    cost = pl.CostEstimate(
        flops=2 * rows * C * C,
        transcendentals=rows * C,
        bytes_accessed=(rows * C * xb                 # read x
                        + rows * C * xb               # write output
                        + w_reads * C * C * wb        # weight traffic (resident vs streamed)
                        + 3 * C * 4))                 # gamma / beta / bias

    out = pl.pallas_call(
        _resblock_kernel,
        out_shape=jax.ShapeDtypeStruct((rows, C), x2.dtype),
        grid_spec=pltpu.PrefetchScalarGridSpec(
            num_scalar_prefetch=0,
            grid=grid,
            in_specs=[
                pl.BlockSpec((tm, C), lambda i, j: (i, 0)),   # x row tile (same for all j)
                pl.BlockSpec((1, C), lambda i, j: (0, 0)),    # LN gamma (resident)
                pl.BlockSpec((1, C), lambda i, j: (0, 0)),    # LN beta  (resident)
                w_spec,                                       # W (resident or streamed)
                pl.BlockSpec((1, tn), lambda i, j: (0, j)),   # Linear bias slice
            ],
            out_specs=pl.BlockSpec((tm, tn), lambda i, j: (i, j)),
            scratch_shapes=[
                pltpu.VMEM((tm, C), xn_dtype),   # LayerNorm output cache (I/O dtype)
                pltpu.VMEM((tm, C), mxu_dtype),  # GELU(xn) in the MXU input dtype
            ]),
        compiler_params=pltpu.CompilerParams(
            # TODO(synk): on v7x, shard the column axis across the two TCs (with a
            # per-core xn/h init) when W cannot be resident, halving W HBM traffic.
            dimension_semantics=("parallel", "arbitrary"),
            vmem_limit_bytes=vmem_limit),
        cost_estimate=cost,
    )(x2, gamma2, beta2, w_in, bias2)

    return out.reshape(orig_shape)


def _reference(x, gamma, beta, w, bias):
    # Pure-JAX (f32) reference matching the PyTorch forward.
    x = x.astype(jnp.float32)
    mean = jnp.mean(x, axis=-1, keepdims=True)
    var = jnp.mean((x - mean) ** 2, axis=-1, keepdims=True)
    xn = ((x - mean) / jnp.sqrt(var + 1e-5) * gamma.astype(jnp.float32)
          + beta.astype(jnp.float32))
    h = jax.nn.gelu(xn, approximate=False)
    return xn + (h @ w.astype(jnp.float32) + bias.astype(jnp.float32))


if __name__ == "__main__":
    # Small shapes consistent with the module: (batch, seq, channels).
    B, S, C = 2, 8, 128
    key = jax.random.PRNGKey(0)
    kx, kw, kb, kg, kbt = jax.random.split(key, 5)

    x = jax.random.normal(kx, (B, S, C), dtype=jnp.float32)
    gamma = 1.0 + 0.1 * jax.random.normal(kg, (C,), dtype=jnp.float32)   # LN weight
    beta = 0.05 * jax.random.normal(kbt, (C,), dtype=jnp.float32)        # LN bias
    w = jax.random.normal(kw, (C, C), dtype=jnp.float32) * 0.05          # Linear weight (in, out)
    bias = jax.random.normal(kb, (C,), dtype=jnp.float32) * 0.01         # Linear bias

    ref = _reference(x, gamma, beta, w, bias)

    # 1) f32 exact-matmul path — tight check.
    out_exact = simple_res_block(x, gamma, beta, w, bias, mxu_bf16=False)
    jax.block_until_ready(out_exact)
    assert jnp.allclose(out_exact, ref, atol=2e-4, rtol=2e-4), "f32 exact mismatch"

    # 2) default path: f32 I/O, bf16 MXU inputs with f32 accumulation.
    out_fast = simple_res_block(x, gamma, beta, w, bias)
    jax.block_until_ready(out_fast)
    assert jnp.allclose(out_fast, ref, atol=2e-2, rtol=2e-2), "bf16-MXU f32-I/O mismatch"

    # 3) bf16 end-to-end path.
    xb_, gb, bb, wb_, biasb = (a.astype(jnp.bfloat16) for a in (x, gamma, beta, w, bias))
    out_bf16 = simple_res_block(xb_, gb, bb, wb_, biasb)
    jax.block_until_ready(out_bf16)
    ref_bf16 = _reference(xb_, gb, bb, wb_, biasb)
    assert jnp.allclose(out_bf16.astype(jnp.float32), ref_bf16, atol=5e-2, rtol=5e-2), \
        "bf16 mismatch"

    # 4) ragged row count (rows % tile != 0): exercises Pallas's masked last block
    #    (no pad/slice round-trip in the wrapper).
    xr = jax.random.normal(kx, (2, 9, C), dtype=jnp.float32)
    out_r = simple_res_block(xr, gamma, beta, w, bias)
    jax.block_until_ready(out_r)
    ref_r = _reference(xr, gamma, beta, w, bias)
    assert jnp.allclose(out_r, ref_r, atol=2e-2, rtol=2e-2), "ragged-rows mismatch"

    print("KERNEL_OK")
</pallas_src>

<mosaic_0001>
module attributes {stable_mosaic.version = 11 : i64} {
  func.func @_resblock_kernel(%arg0: i32, %arg1: i32, %arg2: memref<16x128xf32, #tpu.memory_space<vmem>>, %arg3: memref<1x128xf32, #tpu.memory_space<vmem>>, %arg4: memref<1x128xf32, #tpu.memory_space<vmem>>, %arg5: memref<128x128xf32, #tpu.memory_space<vmem>>, %arg6: memref<1x128xf32, #tpu.memory_space<vmem>>, %arg7: memref<16x128xf32, #tpu.memory_space<vmem>>, %arg8: memref<16x128xf32, #tpu.memory_space<vmem>>, %arg9: memref<16x128xf32, #tpu.memory_space<vmem>>) attributes {dimension_semantics = [#tpu.dimension_semantics<parallel>, #tpu.dimension_semantics<arbitrary>], iteration_bounds = array<i64: 1, 1>, scalar_prefetch = 0 : i64, scratch_operands = 2 : i64, tpu.core_type = #tpu.core_type<tc>, window_params = [{transform_indices = @transform_0, window_bounds = array<i64: 16, 128>}, {pipeline_mode = #tpu.pipeline_mode<synchronous>, transform_indices = @transform_1, window_bounds = array<i64: 1, 128>}, {pipeline_mode = #tpu.pipeline_mode<synchronous>, transform_indices = @transform_2, window_bounds = array<i64: 1, 128>}, {pipeline_mode = #tpu.pipeline_mode<synchronous>, transform_indices = @transform_3, window_bounds = array<i64: 128, 128>}, {transform_indices = @transform_4, window_bounds = array<i64: 1, 128>}, {transform_indices = @transform_5, window_bounds = array<i64: 16, 128>}]} {
    %c0_i32 = arith.constant 0 : i32
    %0 = arith.cmpi eq, %arg1, %c0_i32 : i32
    %1 = arith.extui %0 : i1 to i32
    %c0_i32_0 = arith.constant 0 : i32
    %2 = arith.cmpi ne, %1, %c0_i32_0 : i32
    scf.if %2 {
      %c0_9 = arith.constant 0 : index
      %c0_10 = arith.constant 0 : index
      %15 = vector.load %arg2[%c0_9, %c0_10] : memref<16x128xf32, #tpu.memory_space<vmem>>, vector<16x128xf32>
      %cst_11 = arith.constant dense<0.000000e+00> : vector<16xf32>
      %16 = vector.multi_reduction <add>, %15, %cst_11 [1] : vector<16x128xf32> to vector<16xf32>
      %17 = vector.shape_cast %16 : vector<16xf32> to vector<16x1xf32>
      %cst_12 = arith.constant 1.280000e+02 : f32
      %18 = vector.broadcast %cst_12 : f32 to vector<16x1xf32>
      %19 = arith.divf %17, %18 : vector<16x1xf32>
      %20 = vector.broadcast %19 : vector<16x1xf32> to vector<16x128xf32>
      %21 = arith.subf %15, %20 : vector<16x128xf32>
      %22 = arith.mulf %21, %21 : vector<16x128xf32>
      %cst_13 = arith.constant dense<0.000000e+00> : vector<16xf32>
      %23 = vector.multi_reduction <add>, %22, %cst_13 [1] : vector<16x128xf32> to vector<16xf32>
      %24 = vector.shape_cast %23 : vector<16xf32> to vector<16x1xf32>
      %cst_14 = arith.constant 1.280000e+02 : f32
      %25 = vector.broadcast %cst_14 : f32 to vector<16x1xf32>
      %26 = arith.divf %24, %25 : vector<16x1xf32>
      %cst_15 = arith.constant 9.99999974E-6 : f32
      %27 = vector.broadcast %cst_15 : f32 to vector<16x1xf32>
      %28 = arith.addf %26, %27 : vector<16x1xf32>
      %29 = math.rsqrt %28 : vector<16x1xf32>
      %30 = vector.broadcast %29 : vector<16x1xf32> to vector<16x128xf32>
      %31 = arith.mulf %21, %30 : vector<16x128xf32>
      %c0_16 = arith.constant 0 : index
      %c0_17 = arith.constant 0 : index
      %32 = vector.load %arg3[%c0_16, %c0_17] : memref<1x128xf32, #tpu.memory_space<vmem>>, vector<1x128xf32>
      %33 = vector.broadcast %32 : vector<1x128xf32> to vector<16x128xf32>
      %34 = arith.mulf %31, %33 : vector<16x128xf32>
      %c0_18 = arith.constant 0 : index
      %c0_19 = arith.constant 0 : index
      %35 = vector.load %arg4[%c0_18, %c0_19] : memref<1x128xf32, #tpu.memory_space<vmem>>, vector<1x128xf32>
      %36 = vector.broadcast %35 : vector<1x128xf32> to vector<16x128xf32>
      %37 = arith.addf %34, %36 : vector<16x128xf32>
      %c0_20 = arith.constant 0 : index
      %c0_21 = arith.constant 0 : index
      %38 = vector.load %arg8[%c0_20, %c0_21] : memref<16x128xf32, #tpu.memory_space<vmem>>, vector<16x128xf32>
      tpu.vector_store %arg8[%c0_20, %c0_21], %37 {strides = array<i32>} : memref<16x128xf32, #tpu.memory_space<vmem>>, vector<16x128xf32>,
      %cst_22 = arith.constant 5.000000e-01 : f32
      %39 = vector.broadcast %cst_22 : f32 to vector<16x128xf32>
      %40 = arith.mulf %39, %37 : vector<16x128xf32>
      %cst_23 = arith.constant 0.707106769 : f32
      %41 = vector.broadcast %cst_23 : f32 to vector<16x128xf32>
      %42 = arith.mulf %37, %41 : vector<16x128xf32>
      %43 = math.erf %42 : vector<16x128xf32>
      %cst_24 = arith.constant 1.000000e+00 : f32
      %44 = vector.broadcast %cst_24 : f32 to vector<16x128xf32>
      %45 = arith.addf %44, %43 : vector<16x128xf32>
      %46 = arith.mulf %40, %45 : vector<16x128xf32>
      %c0_25 = arith.constant 0 : index
      %c0_26 = arith.constant 0 : index
      %47 = vector.load %arg9[%c0_25, %c0_26] : memref<16x128xf32, #tpu.memory_space<vmem>>, vector<16x128xf32>
      tpu.vector_store %arg9[%c0_25, %c0_26], %46 {strides = array<i32>} : memref<16x128xf32, #tpu.memory_space<vmem>>, vector<16x128xf32>,
    } else {
    }
    %c0 = arith.constant 0 : index
    %c0_1 = arith.constant 0 : index
    %3 = vector.load %arg9[%c0, %c0_1] : memref<16x128xf32, #tpu.memory_space<vmem>>, vector<16x128xf32>
    %c0_2 = arith.constant 0 : index
    %c0_3 = arith.constant 0 : index
    %4 = vector.load %arg5[%c0_2, %c0_3] : memref<128x128xf32, #tpu.memory_space<vmem>>, vector<128x128xf32>
    %cst = arith.constant dense<0.000000e+00> : vector<16x128xf32>
    %5 = tpu.matmul %3, %4, %cst {dimension_numbers = #tpu.dot_dimension_numbers<[1], [0], [0], [1], [0, 0, 1, 1], [], []>} : vector<16x128xf32>, vector<128x128xf32>, vector<16x128xf32> -> vector<16x128xf32>
    %c0_4 = arith.constant 0 : index
    %c0_5 = arith.constant 0 : index
    %6 = vector.load %arg6[%c0_4, %c0_5] : memref<1x128xf32, #tpu.memory_space<vmem>>, vector<1x128xf32>
    %7 = vector.broadcast %6 : vector<1x128xf32> to vector<16x128xf32>
    %8 = arith.addf %5, %7 : vector<16x128xf32>
    %c128_i32 = arith.constant 128 : i32
    %9 = arith.muli %arg1, %c128_i32 : i32
    %10 = tpu.assume_multiple %9, 128 : i32
    %c0_6 = arith.constant 0 : index
    %11 = arith.index_cast %10 : i32 to index
    %12 = vector.load %arg8[%c0_6, %11] : memref<16x128xf32, #tpu.memory_space<vmem>>, vector<16x128xf32>
    %13 = arith.addf %12, %8 : vector<16x128xf32>
    %c0_7 = arith.constant 0 : index
    %c0_8 = arith.constant 0 : index
    %14 = vector.load %arg7[%c0_7, %c0_8] : memref<16x128xf32, #tpu.memory_space<vmem>>, vector<16x128xf32>
    tpu.vector_store %arg7[%c0_7, %c0_8], %13 {strides = array<i32>} : memref<16x128xf32, #tpu.memory_space<vmem>>, vector<16x128xf32>,
    return
  }
  func.func @transform_0(%arg0: i32, %arg1: i32) -> (i32, i32) {
    %c0_i32 = arith.constant 0 : i32
    %c0_i32_0 = arith.constant 0 : i32
    return %arg0, %c0_i32 : i32, i32
  }
  func.func @transform_1(%arg0: i32, %arg1: i32) -> (i32, i32) {
    %c0_i32 = arith.constant 0 : i32
    %c0_i32_0 = arith.constant 0 : i32
    %c0_i32_1 = arith.constant 0 : i32
    return %c0_i32, %c0_i32_0 : i32, i32
  }
  func.func @transform_2(%arg0: i32, %arg1: i32) -> (i32, i32) {
    %c0_i32 = arith.constant 0 : i32
    %c0_i32_0 = arith.constant 0 : i32
    %c0_i32_1 = arith.constant 0 : i32
    return %c0_i32, %c0_i32_0 : i32, i32
  }
  func.func @transform_3(%arg0: i32, %arg1: i32) -> (i32, i32) {
    %c0_i32 = arith.constant 0 : i32
    %c0_i32_0 = arith.constant 0 : i32
    %c0_i32_1 = arith.constant 0 : i32
    return %c0_i32, %c0_i32_0 : i32, i32
  }
  func.func @transform_4(%arg0: i32, %arg1: i32) -> (i32, i32) {
    %c0_i32 = arith.constant 0 : i32
    %c0_i32_0 = arith.constant 0 : i32
    return %c0_i32, %arg1 : i32, i32
  }
  func.func @transform_5(%arg0: i32, %arg1: i32) -> (i32, i32) {
    %c0_i32 = arith.constant 0 : i32
    return %arg0, %arg1 : i32, i32
  }
}

</mosaic_0001>

<bundles_post_ra>
// kernel: tpu_custom_call.1
= control target key start
LH: loop header
LB: loop body
LE: loop exit
PB: predicated region body
PF: predicated region fallthrough
CT: control target
= control target key end

     0   :  { %10 = vsyncpa [#allocation5], 0  ;;  %s533_s0 = inlined_call_operand.hbm [shape: f32[16,128], index: 0, kind: input, shape index: {}]   ;;  %s534_s1 = inlined_call_operand.hbm [shape: f32[1,128], index: 1, kind: input, shape index: {}]   ;;  %s535_s2 = inlined_call_operand.vmem [shape: f32[1,128], index: 2, kind: input, shape index: {}]   ;;  %s536_s3 = inlined_call_operand.hbm [shape: f32[128,128], index: 3, kind: input, shape index: {}]   ;;  %s537_s4 = inlined_call_operand.vmem [shape: f32[1,128], index: 4, kind: input, shape index: {}]   ;;  %s538_s5 = inlined_call_operand.hbm [shape: f32[16,128], index: 5, kind: output, shape index: {}]  }
   0x1   :  { %11 = vsyncpa [#allocation8], 0  ;;  %s31_s20 = sshll.u32 %s534_s1, 4  ;;  %s32_s20 = int_to_ptr.hbm [resolvable:$true] %s31_s20 }
   0x2   :  { %12 = vsyncpa [#allocation6], 0  ;;  %s439_s21 = smov [#allocation7]   ;;  %s17_s25 = sshll.u32 %s533_s0, 4  ;;  %s18_s25 = int_to_ptr.hbm [resolvable:$true] %s17_s25 }
   0x3   :  { %s33_s22 = sshll.u32 %s439_s21, 4  ;;  %s440_s26 = smov [#allocation4]   ;;  %s34_s22 = int_to_ptr.vmem [resolvable:$true] %s33_s22 }
   0x4   :  { %36 = dma.hbm_to_vmem [thread:$0]  %s32_s20, 16, %s34_s22, [#allocation8]  }
   0x5   :  { %s19_s27 = sshll.u32 %s440_s26, 4  ;;  %s441_s28 = smov 128   ;;  %s20_s27 = int_to_ptr.vmem [resolvable:$true] %s19_s27 }
   0x6   :  { %s442_s29 = smov 8   ;;  %s43_s6 = sshll.u32 %s536_s3, 4  ;;  %s44_s6 = int_to_ptr.hbm [resolvable:$true] %s43_s6 }
   0x7   :  { %25 = dma.hbm_to_vmem [thread:$0]  %s18_s25, 256, %s20_s27, [#allocation5], %s441_s28, %s441_s28, %s442_s29  }
   0x8   :  { %s443_s7 = smov [#allocation9]  }
   0x9   :  { %s45_s8 = sshll.u32 %s443_s7, 4  ;;  %s46_s8 = int_to_ptr.vmem [resolvable:$true] %s45_s8 }
   0xa   :  { %51 = dma.hbm_to_vmem [thread:$0]  %s44_s6, 2048, %s46_s8, [#allocation8], %s441_s28, %s441_s28, %s442_s29  }
   0xb   :  { %433 = dma.done.wait [#allocation5], 256  }
   0xc   :  { %434 = vsyncadd [#allocation5], 4294967040 }
   0xd   :  { %435 = dma.done.wait [#allocation8], 2064  }
   0xe   :  { %436 = vsyncadd [#allocation8], 4294965232  ;;  %v70_v0 = vld [vmem:[#allocation4] sm:$0xff]  ;;  %v71_v1 = vld [vmem:[#allocation4 + $0x8] sm:$0xff]  ;;  %v444_v2 = vmov 128.0   ;;  %s445_s10 = smov [#allocation10]  }
   0xf   :  { %72 = vadd.xlane.f32.xlu0 %v70_v0  ;;  %327 = vrcp.f32 %v444_v2  ;;  %v240_v17 = vld [vmem:[#allocation9 + $0x78] sm:$0xff]  ;;  %v239_v18 = vld [vmem:[#allocation9 + $0x70] sm:$0xff]  ;;  %v238_v21 = vld [vmem:[#allocation9 + $0x68] sm:$0xff]  ;;  %s282_s11 = sshll.u32 %s445_s10, 4  ;;  %s284_s14 = sshll.u32 %s538_s5, 4  ;;  %s283_s11 = int_to_ptr.vmem [resolvable:$true] %s282_s11  ;;  %s285_s14 = int_to_ptr.hbm [resolvable:$true] %s284_s14 }
  0x10   :  { %245 = vmatpush.msra.mxu0 %v240_v17  ;;  %301 = vmatpush.msra.mxu1 %v240_v17  ;;  %v237_v23 = vld [vmem:[#allocation9 + $0x60] sm:$0xff]  ;;  %v236_v24 = vld [vmem:[#allocation9 + $0x58] sm:$0xff]  ;;  %v235_v25 = vld [vmem:[#allocation9 + $0x50] sm:$0xff] }
  0x11   :  { %v234_v28 = vld [vmem:[#allocation9 + $0x48] sm:$0xff]  ;;  %v233_v31 = vld [vmem:[#allocation9 + $0x40] sm:$0xff]  ;;  %v232_v33 = vld [vmem:[#allocation9 + $0x38] sm:$0xff] }
  0x12   :  { %246 = vmatpush.msra.mxu0 %v239_v18  ;;  %302 = vmatpush.msra.mxu1 %v239_v18  ;;  %v231_v35 = vld [vmem:[#allocation9 + $0x30] sm:$0xff]  ;;  %v230_v37 = vld [vmem:[#allocation9 + $0x28] sm:$0xff]  ;;  %v229_v40 = vld [vmem:[#allocation9 + $0x20] sm:$0xff] }
  0x13   :  { %v228_v43 = vld [vmem:[#allocation9 + $0x18] sm:$0xff]  ;;  %v227_v48 = vld [vmem:[#allocation9 + $0x10] sm:$0xff]  ;;  %v325_v49 = vld [vmem:[%s535_s2] ss:$0 sm:$0xff] }
  0x14   :  { %247 = vmatpush.msra.mxu0 %v238_v21  ;;  %303 = vmatpush.msra.mxu1 %v238_v21  ;;  %v324_v44 = vld [vmem:[#allocation7] ss:$0 sm:$0xff]  ;;  %v226_v51 = vld [vmem:[#allocation9 + $0x8] sm:$0xff]  ;;  %v225_v54 = vld [vmem:[#allocation9] sm:$0xff] }
  0x15   :  { %v328_v3 = vpop.eup %327 }
  0x16   :  { %v77_v4 = vmul.f32 128.0, %v328_v3  ;;  %vm81_vm0 = vweird.f32 %v328_v3  ;;  %248 = vmatpush.msra.mxu0 %v237_v23  ;;  %304 = vmatpush.msra.mxu1 %v237_v23 }
  0x17   :  { %74 = vadd.xlane.f32.xlu0 %v71_v1 }
  0x18   :  { %v78_v5 = vsub.f32 1.0, %v77_v4  ;;  %249 = vmatpush.msra.mxu0 %v236_v24  ;;  %305 = vmatpush.msra.mxu1 %v236_v24 }
  0x1a   :  { %v79_v6 = vmul.f32 %v328_v3, %v78_v5  ;;  %250 = vmatpush.msra.mxu0 %v235_v25  ;;  %306 = vmatpush.msra.mxu1 %v235_v25 }
  0x1c   :  { %v80_v7 = vadd.f32 %v328_v3, %v79_v6  ;;  %251 = vmatpush.msra.mxu0 %v234_v28  ;;  %307 = vmatpush.msra.mxu1 %v234_v28 }
  0x1e   :  { %v82_v8 = vsel %vm81_vm0, %v328_v3, %v80_v7  ;;  %252 = vmatpush.msra.mxu0 %v233_v31  ;;  %308 = vmatpush.msra.mxu1 %v233_v31 }
  0x20   :  { %253 = vmatpush.msra.mxu0 %v232_v33  ;;  %309 = vmatpush.msra.mxu1 %v232_v33 }
  0x22   :  { %254 = vmatpush.msra.mxu0 %v231_v35  ;;  %310 = vmatpush.msra.mxu1 %v231_v35 }
  0x24   :  { %255 = vmatpush.msra.mxu0 %v230_v37  ;;  %311 = vmatpush.msra.mxu1 %v230_v37 }
  0x26   :  { %256 = vmatpush.msra.mxu0 %v229_v40  ;;  %312 = vmatpush.msra.mxu1 %v229_v40 }
  0x28   :  { %257 = vmatpush.msra.mxu0 %v228_v43  ;;  %313 = vmatpush.msra.mxu1 %v228_v43 }
  0x2a   :  { %258 = vmatpush.msra.mxu0 %v227_v48  ;;  %314 = vmatpush.msra.mxu1 %v227_v48 }
  0x2c   :  { %259 = vmatpush.msra.mxu0 %v226_v51  ;;  %315 = vmatpush.msra.mxu1 %v226_v51 }
  0x2e   :  { %260 = vmatpush.msra.mxu0 %v225_v54  ;;  %316 = vmatpush.msra.mxu1 %v225_v54 }
  0x82   :  { %v73_v9 = vpop.xlane.xlu0 %72 }
  0x83   :  { %v83_v10 = vmul.f32 %v82_v8, %v73_v9 }
  0x85   :  { %v491_v11 = vsub.f32 %v70_v0, %v83_v10 }
  0x87   :  { %v87_v12 = vmul.f32 %v491_v11, %v491_v11 }
  0x89   :  { %89 = vadd.xlane.f32.xlu1 %v87_v12 }
  0x8a   :  { %v75_v13 = vpop.xlane.xlu0 %74 }
  0x8b   :  { %v84_v14 = vmul.f32 %v82_v8, %v75_v13 }
  0x8d   :  { %v495_v15 = vsub.f32 %v71_v1, %v84_v14 }
  0x8f   :  { %v88_v16 = vmul.f32 %v495_v15, %v495_v15 }
  0x91   :  { %91 = vadd.xlane.f32.xlu1 %v88_v16 }
  0xfc   :  { %v90_v19 = vpop.xlane.xlu1 %89 }
  0xfd   :  { %v93_v20 = vmul.f32 %v90_v19, %v82_v8 }
  0xff   :  { %v95_v22 = vadd.f32 1e-05, %v93_v20 }
 0x101   :  { %329 = vrsqrt.f32 %v95_v22  ;;  %vm103_vm2 = vweird.f32 %v95_v22 }
 0x104   :  { %v92_v26 = vpop.xlane.xlu1 %91 }
 0x105   :  { %v94_v27 = vmul.f32 %v92_v26, %v82_v8 }
 0x107   :  { %v330_v29 = vpop.eup %329  ;;  %v96_v30 = vadd.f32 1e-05, %v94_v27 }
 0x108   :  { %v98_v32 = vmul.f32 %v330_v29, %v95_v22  ;;  %vm104_vm1 = vweird.f32 %v330_v29 }
 0x109   :  { %331 = vrsqrt.f32 %v96_v30  ;;  %vm105_vm3 = vmor %vm103_vm2, %vm104_vm1  ;;  %vm113_vm5 = vweird.f32 %v96_v30 }
 0x10a   :  { %v99_v34 = vmul.f32 %v330_v29, %v98_v32 }
 0x10c   :  { %v100_v36 = vmul.f32 0.5, %v99_v34 }
 0x10e   :  { %v101_v38 = vsub.f32 1.5, %v100_v36 }
 0x10f   :  { %v332_v39 = vpop.eup %331 }
 0x110   :  { %v102_v41 = vmul.f32 %v330_v29, %v101_v38  ;;  %v108_v42 = vmul.f32 %v332_v39, %v96_v30  ;;  %vm114_vm4 = vweird.f32 %v332_v39 }
 0x111   :  { %vm115_vm6 = vmor %vm113_vm5, %vm114_vm4 }
 0x112   :  { %v106_v45 = vsel %vm105_vm3, %v330_v29, %v102_v41  ;;  %v109_v46 = vmul.f32 %v332_v39, %v108_v42 }
 0x113   :  { %v117_v47 = vmul.f32 %v106_v45, %v491_v11 }
 0x114   :  { %v110_v50 = vmul.f32 0.5, %v109_v46 }
 0x115   :  { %v123_v52 = vmul.f32 %v324_v44, %v117_v47 }
 0x116   :  { %v111_v53 = vsub.f32 1.5, %v110_v50 }
 0x117   :  { %v503_v55 = vadd.f32 %v325_v49, %v123_v52 }
 0x118   :  { %v112_v56 = vmul.f32 %v332_v39, %v111_v53 }
 0x119   :  { %v506_v57 = vmul.f32 0.70710677, %v503_v55 }
 0x11a   :  { %v116_v58 = vsel %vm115_vm6, %v332_v39, %v112_v56 }
 0x11b   :  { %v118_v59 = vmul.f32 %v116_v58, %v495_v15  ;;  %v137_v60 = vmul.f32 %v506_v57, %v506_v57 }
 0x11d   :  { %v138_v61 = vmin.f32 %v137_v60, 16.0  ;;  %v124_v62 = vmul.f32 %v324_v44, %v118_v59 }
 0x11f   :  { %v139_v63 = vmul.f32 2.1237322e-06, %v138_v61  ;;  %v150_v0 = vmul.f32 3.8918573e-05, %v138_v61  ;;  %v511_v1 = vadd.f32 %v325_v49, %v124_v62 }
 0x121   :  { %v140_v2 = vadd.f32 0.00028619796, %v139_v63  ;;  %v151_v3 = vadd.f32 0.001143296, %v150_v0  ;;  %v514_v4 = vmul.f32 0.70710677, %v511_v1 }
 0x122   :  { %v133_v0 = vmul.f32 0.5, %v503_v55 }
 0x123   :  { %v141_v5 = vmul.f32 %v140_v2, %v138_v61  ;;  %v152_v6 = vmul.f32 %v151_v3, %v138_v61  ;;  %v177_v7 = vmul.f32 %v514_v4, %v514_v4 }
 0x125   :  { %v153_v8 = vadd.f32 0.014752088, %v152_v6  ;;  %v142_v9 = vadd.f32 0.0036580483, %v141_v5  ;;  %v178_v10 = vmin.f32 %v177_v7, 16.0 }
 0x127   :  { %v154_v11 = vmul.f32 %v153_v8, %v138_v61  ;;  %v179_v12 = vmul.f32 2.1237322e-06, %v178_v10  ;;  %v190_v13 = vmul.f32 3.8918573e-05, %v178_v10  ;;  %v143_v15 = vmul.f32 %v142_v9, %v138_v61 }
 0x129   :  { %v155_v14 = vadd.f32 0.112945676, %v154_v11  ;;  %v180_v16 = vadd.f32 0.00028619796, %v179_v12  ;;  %v191_v17 = vadd.f32 0.001143296, %v190_v13 }
 0x12a   :  { %v144_v22 = vadd.f32 0.05243302, %v143_v15  ;;  %v134_v11 = vmul.f32 0.5, %v511_v1 }
 0x12b   :  { %v156_v18 = vmul.f32 %v155_v14, %v138_v61  ;;  %v181_v19 = vmul.f32 %v180_v16, %v178_v10  ;;  %v192_v20 = vmul.f32 %v191_v17, %v178_v10  ;;  %v326_v14 = vld [vmem:[%s537_s4] ss:$0 sm:$0xff] }
 0x12c   :  { %v145_v28 = vmul.f32 %v144_v22, %v138_v61 }
 0x12d   :  { %v157_v21 = vadd.f32 0.4994258, %v156_v18  ;;  %v193_v23 = vadd.f32 0.014752088, %v192_v20  ;;  %v182_v25 = vadd.f32 0.0036580483, %v181_v19 }
 0x12e   :  { %v146_v32 = vadd.f32 0.18741608, %v145_v28 }
 0x12f   :  { %v158_v24 = vmul.f32 %v157_v21, %v138_v61  ;;  %v194_v26 = vmul.f32 %v193_v23, %v178_v10  ;;  %v183_v30 = vmul.f32 %v182_v25, %v178_v10 }
 0x130   :  { %v147_v37 = vmul.f32 %v146_v32, %v138_v61 }
 0x131   :  { %v159_v27 = vadd.f32 1.0, %v158_v24  ;;  %v195_v29 = vadd.f32 0.112945676, %v194_v26  ;;  %v184_v34 = vadd.f32 0.05243302, %v183_v30 }
 0x132   :  { %v148_v43 = vadd.f32 1.1283791, %v147_v37 }
 0x133   :  { %333 = vrcp.f32 %v159_v27  ;;  %v196_v31 = vmul.f32 %v195_v29, %v178_v10  ;;  %v185_v40 = vmul.f32 %v184_v34, %v178_v10  ;;  %v171_v42 = vand.u32 2147483648, %v159_v27 }
 0x134   :  { %v169_v45 = vand.u32 2147483647, %v159_v27  ;;  %vm165_vm8 = vweird.f32 %v159_v27  ;;  %v149_v50 = vmul.f32 %v148_v43, %v506_v57 }
 0x135   :  { %v197_v33 = vadd.f32 0.4994258, %v196_v31  ;;  %v186_v46 = vadd.f32 0.18741608, %v185_v40  ;;  %v172_v48 = vor.u32 1.1754944e-38, %v171_v42 }
 0x136   :  { %vm170_vm10 = vcmp.eq.f32.partialorder %v169_v45, 8.507059e+37 }
 0x137   :  { %v198_v35 = vmul.f32 %v197_v33, %v178_v10  ;;  %v187_v53 = vmul.f32 %v186_v46, %v178_v10 }
 0x139   :  { %v334_v36 = vpop.eup %333  ;;  %v199_v39 = vadd.f32 1.0, %v198_v35  ;;  %v188_v61 = vadd.f32 1.1283791, %v187_v53 }
 0x13a   :  { %v161_v38 = vmul.f32 %v334_v36, %v159_v27  ;;  %vm166_vm7 = vweird.f32 %v334_v36 }
 0x13b   :  { %335 = vrcp.f32 %v199_v39  ;;  %vm167_vm9 = vmor %vm165_vm8, %vm166_vm7  ;;  %v211_v60 = vand.u32 2147483648, %v199_v39  ;;  %v209_v63 = vand.u32 2147483647, %v199_v39  ;;  %vm205_vm12 = vweird.f32 %v199_v39 }
 0x13c   :  { %v162_v41 = vsub.f32 1.0, %v161_v38  ;;  %v189_v6 = vmul.f32 %v188_v61, %v514_v4 }
 0x13d   :  { %v212_v57 = vor.u32 1.1754944e-38, %v211_v60  ;;  %vm210_vm14 = vcmp.eq.f32.partialorder %v209_v63, 8.507059e+37 }
 0x13e   :  { %v163_v44 = vmul.f32 %v334_v36, %v162_v41 }
 0x140   :  { %v164_v47 = vadd.f32 %v334_v36, %v163_v44 }
 0x141   :  { %v336_v49 = vpop.eup %335 }
 0x142   :  { %v168_v51 = vsel %vm167_vm9, %v334_v36, %v164_v47  ;;  %v201_v54 = vmul.f32 %v336_v49, %v199_v39  ;;  %vm206_vm11 = vweird.f32 %v336_v49 }
 0x143   :  { %v173_v52 = vsel %vm170_vm10, %v172_v48, %v168_v51  ;;  %vm207_vm13 = vmor %vm205_vm12, %vm206_vm11 }
 0x144   :  { %v174_v56 = vmul.f32 %v173_v52, %v149_v50  ;;  %v202_v58 = vsub.f32 1.0, %v201_v54 }
 0x146   :  { %v299_v59 = vclamps-f32 %v174_v56, 1.0  ;;  %v203_v62 = vmul.f32 %v336_v49, %v202_v58 }
 0x148   :  { %v217_v2 = vadd.f32 1.0, %v299_v59  ;;  %v204_v3 = vadd.f32 %v336_v49, %v203_v62 }
 0x14a   :  { %v219_v5 = vmul.f32 %v217_v2, %v133_v0  ;;  %v208_v7 = vsel %vm207_vm13, %v336_v49, %v204_v3 }
 0x14b   :  { %v213_v8 = vsel %vm210_vm14, %v212_v57, %v208_v7 }
 0x14c   :  { %261 = vmatmul.f32.vlgmr.msra.gmra.mxu0 %v219_v5  ;;  %v214_v9 = vmul.f32 %v213_v8, %v189_v6 }
 0x14e   :  { %v300_v10 = vclamps-f32 %v214_v9, 1.0 }
 0x150   :  { %v218_v12 = vadd.f32 1.0, %v300_v10 }
 0x152   :  { %v220_v13 = vmul.f32 %v218_v12, %v134_v11 }
 0x154   :  { %264 = vmatmul.f32.vlgmr.msra.gmra.mxu1 %v220_v13 }
 0x1c9   :  { %v262_v15 = vpop.f32.mrf.mxu0 }
 0x1ca   :  { %v263_v16 = vadd.f32 %v326_v14, %v262_v15 }
 0x1cc   :  { %v274_v17 = vadd.f32 %v263_v16, %v503_v55 }
 0x1ce   :  { %276 = vst [vmem:[#allocation10] sm:$0xff] %v274_v17 }
 0x1d1   :  { %v265_v4 = vpop.f32.mrf.mxu1 }
 0x1d2   :  { %v266_v18 = vadd.f32 %v326_v14, %v265_v4 }
 0x1d4   :  { %v275_v19 = vadd.f32 %v266_v18, %v511_v1 }
 0x1d6   :  { %277 = vst [vmem:[#allocation10 + $0x8] sm:$0xff] %v275_v19 }
 0x1d7   :  { %290 = dma.vmem_to_hbm [thread:$0]  %s283_s11, 256, %s285_s14, [#allocation6], %s441_s28, %s441_s28, %s442_s29  }
 0x1d8   :  { %437 = dma.done.wait [#allocation6], 256  }
 0x1d9   :  { %438 = vsyncadd [#allocation6], 4294967040 }
 0x1da   :  { %295 = vsyncpa [#allocation5], 1 }
 0x1db   :  { %296 = vsyncpa [#allocation8], 1 }
 0x1dc   :  { %297 = vsyncpa [#allocation6], 1 }

</bundles_post_ra>
